<compile_context>
chip_gen: v5e
topology: v5e:2x2
jax: 0.10.0
libtpu: 0.0.40
codegen_flags: <defaults>
</compile_context>

<pallas_src>
import functools

import jax
import jax.numpy as jnp
from jax import lax
from jax.experimental import pallas as pl
from jax.experimental.pallas import tpu as pltpu


# ----------------------------------------------------------------------------
# Kernels
# ----------------------------------------------------------------------------

def _conv3x3_kernel(x_ref, w_ref, b_ref, o_ref, *, H, W):
    """3x3 conv, stride 1, padding 1, in NC(H*W) layout.

    x_ref: (Bt, Cin, H*W)   input block, lane axis = H*W (dense)
    w_ref: (9, Cout, Cin)   tap-major weights (tap = kh*3 + kw)
    b_ref: (Cout, 1)        bias
    o_ref: (Bt, Cout, H*W)  output block, lane axis = H*W (dense)
    """
    Bt, Cin, HW = x_ref.shape
    Cout = w_ref.shape[1]

    x = x_ref[...]  # (Bt, Cin, HW)

    # Flattened-position -> (h, w) indices; hoisted out of the tap loop.
    pos = lax.broadcasted_iota(jnp.int32, (1, 1, HW), 2)
    h_idx = pos // W
    w_idx = pos % W

    # Build the 9 shifted + boundary-masked views of the input once (shared
    # across the batch elements of this block).  Shifts go to the XLU, masks
    # to the VPU; no slice/reshape relayout copies.
    taps = []
    for kh in range(3):
        for kw in range(3):
            dh, dw = kh - 1, kw - 1
            if dh == 0 and dw == 0:
                taps.append(x)
            else:
                shift = (-(dh * W + dw)) % HW
                xs = pltpu.roll(x, shift=shift, axis=2)
                valid = ((h_idx + dh >= 0) & (h_idx + dh < H) &
                         (w_idx + dw >= 0) & (w_idx + dw < W))
                taps.append(jnp.where(valid, xs, jnp.zeros_like(xs)))

    # Hoist weight/bias loads + casts out of the batch loop.
    w_all = w_ref[...].astype(jnp.float32)     # (9, Cout, Cin)
    bias = b_ref[...].astype(jnp.float32)      # (Cout, 1) broadcasts over HW

    for i in range(Bt):
        acc = jnp.zeros((Cout, HW), jnp.float32)
        for t in range(9):
            acc = acc + jnp.dot(w_all[t], taps[t][i].astype(jnp.float32),
                                preferred_element_type=jnp.float32)
        o_ref[i] = (acc + bias).astype(o_ref.dtype)


def _conv1x1_kernel(x_ref, w_ref, b_ref, o_ref):
    """Pointwise (1x1) conv in NC(H*W) layout.

    x_ref: (Bt, Cin, H*W), w_ref: (Cout, Cin), b_ref: (Cout, 1),
    o_ref: (Bt, Cout, H*W).
    """
    Bt = x_ref.shape[0]
    w = w_ref[...].astype(jnp.float32)
    b = b_ref[...].astype(jnp.float32)
    for i in range(Bt):
        o_ref[i] = (jnp.dot(w, x_ref[i].astype(jnp.float32),
                            preferred_element_type=jnp.float32) + b
                    ).astype(o_ref.dtype)


# ----------------------------------------------------------------------------
# Wrappers
# ----------------------------------------------------------------------------

def conv2d_3x3_same(x_nchw, weight_oihw, bias, *, batch_tile=1):
    """nn.Conv2d(Cin, Cout, kernel_size=3, stride=1, padding=1) (PatchProjection)."""
    B, Cin, H, W = x_nchw.shape
    Cout = weight_oihw.shape[0]
    HW = H * W

    # Free metadata reshape: merge the contiguous (H, W) dims so the lane axis
    # of every block is the dense H*W spatial axis.  No pad, no transpose.
    x_flat = x_nchw.reshape(B, Cin, HW)

    # Tap-major weights (Cout, Cin, 3, 3) -> (9, Cout, Cin).  Tiny, one-time.
    w_taps = jnp.transpose(weight_oihw, (2, 3, 0, 1)).reshape(9, Cout, Cin)
    b2 = bias.reshape(Cout, 1)

    Bt = max(1, min(batch_tile, B))
    assert B % Bt == 0, "batch_tile must divide batch"

    kernel = functools.partial(_conv3x3_kernel, H=H, W=W)

    out_flat = pl.pallas_call(
        kernel,
        out_shape=jax.ShapeDtypeStruct((B, Cout, HW), x_nchw.dtype),
        grid_spec=pltpu.PrefetchScalarGridSpec(
            num_scalar_prefetch=0,
            grid=(B // Bt,),
            in_specs=[
                pl.BlockSpec((Bt, Cin, HW), lambda b: (b, 0, 0)),
                pl.BlockSpec((9, Cout, Cin), lambda b: (0, 0, 0)),
                pl.BlockSpec((Cout, 1), lambda b: (0, 0)),
            ],
            out_specs=pl.BlockSpec((Bt, Cout, HW), lambda b: (b, 0, 0)),
        ),
        compiler_params=pltpu.CompilerParams(
            dimension_semantics=("parallel",)),
    )(x_flat, w_taps, b2)

    # Free metadata reshape back to NCHW; data is already in NCHW order.
    return out_flat.reshape(B, Cout, H, W)


def conv2d_1x1(x_nchw, weight_oihw, bias, *, batch_tile=1):
    """nn.Conv2d(Cin, Cout, kernel_size=1, stride=1, padding=0) (channel4to12)."""
    B, Cin, H, W = x_nchw.shape
    Cout = weight_oihw.shape[0]
    HW = H * W

    x_flat = x_nchw.reshape(B, Cin, HW)
    w2 = weight_oihw.reshape(Cout, Cin)
    b2 = bias.reshape(Cout, 1)

    Bt = max(1, min(batch_tile, B))
    assert B % Bt == 0, "batch_tile must divide batch"

    out_flat = pl.pallas_call(
        _conv1x1_kernel,
        out_shape=jax.ShapeDtypeStruct((B, Cout, HW), x_nchw.dtype),
        grid_spec=pltpu.PrefetchScalarGridSpec(
            num_scalar_prefetch=0,
            grid=(B // Bt,),
            in_specs=[
                pl.BlockSpec((Bt, Cin, HW), lambda b: (b, 0, 0)),
                pl.BlockSpec((Cout, Cin), lambda b: (0, 0)),
                pl.BlockSpec((Cout, 1), lambda b: (0, 0)),
            ],
            out_specs=pl.BlockSpec((Bt, Cout, HW), lambda b: (b, 0, 0)),
        ),
        compiler_params=pltpu.CompilerParams(
            dimension_semantics=("parallel",)),
    )(x_flat, w2, b2)

    return out_flat.reshape(B, Cout, H, W)


def pixel_unshuffle(x, r):
    """torch.nn.PixelUnshuffle(r) — pure layout transform (wrapper-side)."""
    B, C, H, W = x.shape
    x = x.reshape(B, C, H // r, r, W // r, r)
    x = jnp.transpose(x, (0, 1, 3, 5, 2, 4))
    return x.reshape(B, C * r * r, H // r, W // r)


def pixel_shuffle(x, r):
    """torch.nn.PixelShuffle(r) — pure layout transform (wrapper-side)."""
    B, C, H, W = x.shape
    Co = C // (r * r)
    x = x.reshape(B, Co, r, r, H, W)
    x = jnp.transpose(x, (0, 1, 4, 2, 5, 3))
    return x.reshape(B, Co, H * r, W * r)


# ----------------------------------------------------------------------------
# Demo / correctness check
# ----------------------------------------------------------------------------

if __name__ == "__main__":
    key = jax.random.PRNGKey(0)
    kx, k1, k2, k3, k4, k5, k6 = jax.random.split(key, 7)

    B, H0, W0 = 2, 32, 32
    channel = 32

    # Raw single-channel input (as in Former_Freq_Embed: pack -> 4 channels).
    x = jax.random.normal(kx, (B, 1, H0, W0), dtype=jnp.float32)

    # channel4to12: Conv2d(4, 12, 1) with bias.
    w14 = jax.random.normal(k1, (12, 4, 1, 1), dtype=jnp.float32) * 0.2
    b14 = jax.random.normal(k2, (12,), dtype=jnp.float32) * 0.1
    # input_projection: Conv2d(12, 32, 3, padding=1) with bias.
    w_in = jax.random.normal(k3, (channel, 12, 3, 3), dtype=jnp.float32) * 0.1
    b_in = jax.random.normal(k4, (channel,), dtype=jnp.float32) * 0.1
    # output_projection: Conv2d(32, 12, 3, padding=1) with bias.
    w_out = jax.random.normal(k5, (12, channel, 3, 3), dtype=jnp.float32) * 0.1
    b_out = jax.random.normal(k6, (12,), dtype=jnp.float32) * 0.1

    # ---- Pallas pipeline (front / back of Former_Freq_Embed.forward) ----
    packed = pixel_unshuffle(x, 2)                  # self.pack        (B,4,16,16)
    temp = conv2d_1x1(packed, w14, b14)             # self.channel4to12 (B,12,16,16)
    feats = conv2d_3x3_same(temp, w_in, b_in)       # self.input_projection (B,32,16,16)
    # TODO(synk): U-Net transformer body (FrequencyAttention with rFFT,
    # WithBias LayerNorm, FFN, Down/Upsample) not kernelized; identity here.
    proj = conv2d_3x3_same(feats, w_out, b_out)     # self.output_projection (B,12,16,16)
    out = pixel_shuffle(proj + temp, 2)             # residual + self.unpack (B,3,32,32)
    out = jax.block_until_ready(out)

    # ---- Reference with XLA convs (same per-op semantics as nn.Conv2d) ----
    def conv_ref(z, w, b, pad):
        return lax.conv_general_dilated(
            z, w, window_strides=(1, 1), padding=((pad, pad), (pad, pad)),
            dimension_numbers=("NCHW", "OIHW", "NCHW"),
            precision=lax.Precision.HIGHEST) + b.reshape(1, -1, 1, 1)

    temp_r = conv_ref(packed, w14, b14, 0)
    feats_r = conv_ref(temp_r, w_in, b_in, 1)
    proj_r = conv_ref(feats_r, w_out, b_out, 1)
    ref = pixel_shuffle(proj_r + temp_r, 2)
    ref = jax.block_until_ready(ref)

    assert temp.shape == (B, 12, H0 // 2, W0 // 2)
    assert feats.shape == (B, channel, H0 // 2, W0 // 2)
    assert out.shape == (B, 3, H0, W0)
    assert jnp.allclose(temp, temp_r, atol=1e-3, rtol=1e-3)
    assert jnp.allclose(feats, feats_r, atol=1e-3, rtol=1e-3)
    assert jnp.allclose(out, ref, atol=1e-3, rtol=1e-3)
    print("KERNEL_OK")
</pallas_src>

<mosaic_0001>
module attributes {stable_mosaic.version = 11 : i64} {
  func.func @_conv1x1_kernel(%arg0: i32, %arg1: memref<1x4x256xf32, #tpu.memory_space<vmem>>, %arg2: memref<12x4xf32, #tpu.memory_space<vmem>>, %arg3: memref<12x1xf32, #tpu.memory_space<vmem>>, %arg4: memref<1x12x256xf32, #tpu.memory_space<vmem>>) attributes {dimension_semantics = [#tpu.dimension_semantics<parallel>], iteration_bounds = array<i64: 2>, scalar_prefetch = 0 : i64, scratch_operands = 0 : i64, tpu.core_type = #tpu.core_type<tc>, window_params = [{transform_indices = @transform_0, window_bounds = array<i64: 1, 4, 256>}, {pipeline_mode = #tpu.pipeline_mode<synchronous>, transform_indices = @transform_1, window_bounds = array<i64: 12, 4>}, {pipeline_mode = #tpu.pipeline_mode<synchronous>, transform_indices = @transform_2, window_bounds = array<i64: 12, 1>}, {transform_indices = @transform_3, window_bounds = array<i64: 1, 12, 256>}]} {
    %c0 = arith.constant 0 : index
    %c0_0 = arith.constant 0 : index
    %0 = vector.load %arg2[%c0, %c0_0] : memref<12x4xf32, #tpu.memory_space<vmem>>, vector<12x4xf32>
    %c0_1 = arith.constant 0 : index
    %c0_2 = arith.constant 0 : index
    %1 = vector.load %arg3[%c0_1, %c0_2] : memref<12x1xf32, #tpu.memory_space<vmem>>, vector<12x1xf32>
    %c0_3 = arith.constant 0 : index
    %c0_4 = arith.constant 0 : index
    %c0_5 = arith.constant 0 : index
    %2 = vector.load %arg1[%c0_3, %c0_4, %c0_5] : memref<1x4x256xf32, #tpu.memory_space<vmem>>, vector<1x4x256xf32>
    %3 = vector.shape_cast %2 : vector<1x4x256xf32> to vector<4x256xf32>
    %cst = arith.constant dense<0.000000e+00> : vector<12x256xf32>
    %4 = tpu.matmul %0, %3, %cst {dimension_numbers = #tpu.dot_dimension_numbers<[1], [0], [0], [1], [0, 0, 1, 1], [], []>} : vector<12x4xf32>, vector<4x256xf32>, vector<12x256xf32> -> vector<12x256xf32>
    %5 = vector.broadcast %1 : vector<12x1xf32> to vector<12x256xf32>
    %6 = arith.addf %4, %5 : vector<12x256xf32>
    %c0_6 = arith.constant 0 : index
    %c0_7 = arith.constant 0 : index
    %c0_8 = arith.constant 0 : index
    %7 = vector.load %arg4[%c0_6, %c0_7, %c0_8] : memref<1x12x256xf32, #tpu.memory_space<vmem>>, vector<1x12x256xf32>
    %8 = vector.shape_cast %7 : vector<1x12x256xf32> to vector<12x256xf32>
    %9 = vector.shape_cast %6 : vector<12x256xf32> to vector<1x12x256xf32>
    tpu.vector_store %arg4[%c0_6, %c0_7, %c0_8], %9 {strides = array<i32>} : memref<1x12x256xf32, #tpu.memory_space<vmem>>, vector<1x12x256xf32>,
    return
  }
  func.func @transform_0(%arg0: i32) -> (i32, i32, i32) {
    %c0_i32 = arith.constant 0 : i32
    %c0_i32_0 = arith.constant 0 : i32
    %c0_i32_1 = arith.constant 0 : i32
    return %arg0, %c0_i32, %c0_i32_0 : i32, i32, i32
  }
  func.func @transform_1(%arg0: i32) -> (i32, i32) {
    %c0_i32 = arith.constant 0 : i32
    %c0_i32_0 = arith.constant 0 : i32
    %c0_i32_1 = arith.constant 0 : i32
    return %c0_i32, %c0_i32_0 : i32, i32
  }
  func.func @transform_2(%arg0: i32) -> (i32, i32) {
    %c0_i32 = arith.constant 0 : i32
    %c0_i32_0 = arith.constant 0 : i32
    %c0_i32_1 = arith.constant 0 : i32
    return %c0_i32, %c0_i32_0 : i32, i32
  }
  func.func @transform_3(%arg0: i32) -> (i32, i32, i32) {
    %c0_i32 = arith.constant 0 : i32
    %c0_i32_0 = arith.constant 0 : i32
    %c0_i32_1 = arith.constant 0 : i32
    return %arg0, %c0_i32, %c0_i32_0 : i32, i32, i32
  }
}

</mosaic_0001>

<bundles_post_ra>
// kernel: tpu_custom_call.1
= control target key start
LH: loop header
LB: loop body
LE: loop exit
PB: predicated region body
PF: predicated region fallthrough
CT: control target
= control target key end

     0   :  { %s367_s12 = smov 0   ;;  %s396_s0 = inlined_call_operand.vmem [shape: f32[2,4,256], index: 0, kind: input, shape index: {}]   ;;  %s397_s1 = inlined_call_operand.vmem [shape: f32[12,4], index: 1, kind: input, shape index: {}]   ;;  %s398_s2 = inlined_call_operand.vmem [shape: f32[12,1], index: 2, kind: input, shape index: {}]   ;;  %s399_s3 = inlined_call_operand.vmem [shape: f32[2,12,256], index: 3, kind: output, shape index: {}]  }
   0x1 LB: > { %s307_s13 = sadd.s32 4294967295, %s344_s12   ;;  %p311_p0 = scmp.ge.s32.totalorder %s344_s12, 1  ;;  %s344_s12 = sphi %s367_s12, %s13_s12  }
   0x2   : > { %p137_p1 = scmp.lt.s32.totalorder %s344_s12, 3 }
   0x4   : > { %p138_p2 = pnand %p311_p0, %p137_p1 }
   0x5   : > { %p161_p3 = scmp.lt.s32.totalorder (!%p138_p2), %s307_s13, 1 }
   0x6   : > { %141 = sbr.rel (%p138_p2) target bundleno = 161 (0xa1), region = 32 }
   0xb   : > { %v173_v0 = vld [vmem:[%s398_s2] sm:$0xff]  ;;  %v346_v1 = vmov 0   ;;  %s401_s13 = smov (!%p161_p3, %s307_s13), 1  ;;  %v174_v3 = vld [vmem:[%s398_s2 + $0x8] sm:$0xf]  ;;  %vm197_vm0 = vcmask 1043456  }
   0xc   : > { %337 = vset.pattern.permute.xlu0 %v346_v1  ;;  %s324_s16 = sshll.u32 %s401_s13, 3  ;;  %v171_v4 = vld [vmem:[%s397_s1] sm:$0xff]  ;;  %vm190_vm1 = vcmask 31744   ;;  %v172_v5 = vld [vmem:[%s397_s1 + $0x8] sm:$0xf]  ;;  %s325_s26 = sshll.u32 %s401_s13, 5 }
   0xd   : > { %178 = vperm.xlu0 %337, %v173_v0   ;;  %s165_s19 = scalar_lea.vmem %s396_s0, %s324_s16  ;;  %s170_s29 = scalar_lea.vmem %s399_s3, %s325_s26 }
   0xe   : > { %v175_v2 = vld [vmem:[%s165_s19] sm:$0xff] }
   0xf   : > { %187 = vst [vmem:[#allocation1] ss:$2 sm:$0xff] %v175_v2 }
  0x15   : > { %183 = vperm.xlu0 %337, %v174_v3  }
  0x16   : > { %v188_v6 = vld.sshfl [vmem:[#allocation1] sm:$0xff pattern:$0x75316420]  ;;  %v189_v7 = vld.sshfl [vmem:[#allocation1 + $0x8] sm:$0xff pattern:$0x75316420] }
  0x17   : > { %316 = vmatpush.msk.msra.mxu0 %vm197_vm0, %v188_v6  ;;  %326 = vmatpush.msk.msra.mxu2 %vm197_vm0, %v188_v6 }
  0x18   : > { %319 = vmatpush.msk.msra.mxu1 %vm197_vm0, %v189_v7  ;;  %327 = vmatpush.msk.msra.mxu3 %vm197_vm0, %v189_v7 }
  0x19   : > { %317 = vmatmul.msk.f32.vlgmr.msra.gmra.mxu0 %vm190_vm1, %v171_v4  ;;  %318 = vmatmul.msk.f32.vlgmr.msra.gmra.mxu2 %vm190_vm1, %v172_v5 }
  0x1a   : > { %320 = vmatmul.msk.f32.vlgmr.msra.gmra.mxu1 %vm190_vm1, %v171_v4  ;;  %321 = vmatmul.msk.f32.vlgmr.msra.gmra.mxu3 %vm190_vm1, %v172_v5 }
  0x7f   : > { %v179_v8 = vpop.permute.xlu0 %178 }
  0x87   : > { %v184_v13 = vpop.permute.xlu0 %183 }
  0x96   : > { %v219_v9 = vpop.f32.mrf.mxu0 }
  0x97   : > { %v220_v10 = vadd.f32 %v219_v9, %v179_v8  ;;  %v242_v11 = vpop.f32.mrf.mxu1 }
  0x98   : > { %v243_v12 = vadd.f32 %v242_v11, %v179_v8 }
  0x99   : > { %248 = vst [vmem:[%s170_s29] sm:$0xff] %v220_v10 }
  0x9a   : > { %249 = vst [vmem:[%s170_s29 + $0x8] sm:$0xff] %v243_v12 }
  0x9c   : > { %v222_v14 = vpop.f32.mrf.mxu2 }
  0x9d   : > { %v223_v15 = vadd.f32 %v222_v14, %v184_v13  ;;  %v245_v16 = vpop.f32.mrf.mxu3 }
  0x9e   : > { %v246_v17 = vadd.f32 %v245_v16, %v184_v13 }
  0x9f   : > { %250 = vst [vmem:[%s170_s29 + $0x10] sm:$0xf] %v223_v15 }
  0xa0   : > { %251 = vst [vmem:[%s170_s29 + $0x18] sm:$0xf] %v246_v17 }
  0xa1 PF: > { %s13_s12 = sadd.s32 1, %s344_s12  }
  0xa2   : > { %p10_p4 = scmp.ge.s32.totalorder %s13_s12, 4  }
  0xa4   :  { %12 = sbr.rel (!%p10_p4) target bundleno = 1 (0x1), region = 62 }

</bundles_post_ra>
